<compile_context>
chip_gen: v6e
topology: v6e:2x2x1
jax: 0.10.0
libtpu: 0.0.40
codegen_flags: <defaults>
</compile_context>

<pallas_src>
import functools

import jax
import jax.numpy as jnp
from jax.experimental import pallas as pl
from jax.experimental.pallas import tpu as pltpu


def _round_up(n, m):
    return ((n + m - 1) // m) * m


def _vmem_limit(nbytes):
    # Generous headroom, but stay well under v7x's 64 MiB/TC physical VMEM.
    return int(min(max(2 * nbytes + (4 << 20), 16 << 20), 48 << 20))


# ----------------------------------------------------------------------------
# Kernel 1: per-node projections  y_all = x @ [W^T | w_src | w_tgt | 0-pad]
#   One MXU matmul over all nodes; width padded to a multiple of 128 lanes.
# ----------------------------------------------------------------------------
def _node_proj_kernel(x_ref, w_ref, y_ref):
    y_ref[...] = jnp.dot(x_ref[...], w_ref[...],
                         preferred_element_type=jnp.float32)


def _node_projection(x, w_cat, tile_n):
    N, C_in = x.shape
    Cp = w_cat.shape[1]
    sub = 16 if x.dtype == jnp.bfloat16 else 8        # bf16 packs 2 rows / sublane
    tn = max(sub, min(_round_up(tile_n, sub), _round_up(N, sub)))
    grid = pl.cdiv(N, tn)
    itemsize = jnp.dtype(x.dtype).itemsize
    vmem = _vmem_limit(2 * (tn * C_in * itemsize + C_in * Cp * itemsize + tn * Cp * 4))
    return pl.pallas_call(
        _node_proj_kernel,
        out_shape=jax.ShapeDtypeStruct((N, Cp), jnp.float32),
        grid_spec=pltpu.PrefetchScalarGridSpec(
            num_scalar_prefetch=0,
            grid=(grid,),
            in_specs=[
                pl.BlockSpec((tn, C_in), lambda i: (i, 0)),   # x tile (ragged last block OK)
                pl.BlockSpec((C_in, Cp), lambda i: (0, 0)),   # fused weights (resident)
            ],
            out_specs=pl.BlockSpec((tn, Cp), lambda i: (i, 0)),
        ),
        compiler_params=pltpu.CompilerParams(
            dimension_semantics=("parallel",),
            vmem_limit_bytes=vmem),
        cost_estimate=pl.CostEstimate(
            flops=2 * N * C_in * Cp,
            transcendentals=0,
            bytes_accessed=itemsize * (N * C_in + C_in * Cp) + 4 * N * Cp),
    )(x, w_cat)


# ----------------------------------------------------------------------------
# Kernel 2 (fused edge stage): for each edge tile
#   g    = one_hot(row) @ y                      (gather, MXU)
#   msg  = norm * g + b ;  msg *= sigmoid(gate)  (VPU / EUP)
#   out += one_hot(col)^T @ msg                  (scatter-add, MXU)
# y and out stay resident in VMEM across the whole (sequential) edge grid.
# ----------------------------------------------------------------------------
def _fused_edge_kernel(row_ref, colT_ref, coef_ref, y_ref, b_ref, o_ref, *,
                       use_gate, n_nodes):
    @pl.when(pl.program_id(0) == 0)
    def _init():
        o_ref[...] = jnp.zeros_like(o_ref)

    te = row_ref.shape[0]

    # Gather y[row] via one-hot matmul (no (E,C) HBM round-trip).
    iota_row = jax.lax.broadcasted_iota(jnp.int32, (te, n_nodes), 1)
    onehot_row = (iota_row == row_ref[...]).astype(jnp.float32)            # (te, N)
    g = jnp.dot(onehot_row, y_ref[...], preferred_element_type=jnp.float32)  # (te, Cp)

    coef = coef_ref[...]                                                    # (te, 2)
    msg = coef[:, 0:1] * g + b_ref[...]                                     # norm * y_row + b
    if use_gate:
        msg = jax.nn.sigmoid(coef[:, 1:2]) * msg                            # EUP sigmoid

    # Scatter-add to destination nodes via transposed one-hot matmul.
    iota_col = jax.lax.broadcasted_iota(jnp.int32, (n_nodes, te), 0)
    onehot_colT = (iota_col == colT_ref[...]).astype(jnp.float32)           # (N, te)
    o_ref[...] += jnp.dot(onehot_colT, msg, preferred_element_type=jnp.float32)


def _edge_aggregate(y_all, row, col, norm_e, gate_logit_e, bias_pad, *,
                    use_gate, n_nodes, tile_e):
    E = row.shape[0]
    N, Cp = y_all.shape

    # Edge tile: multiple of 128, largest that keeps one-hot temporaries modest.
    te_cap = max(128, min(_round_up(tile_e, 128), _round_up(E, 128)))
    te = 128
    for cand in (256, 512, 1024, 2048, 4096, 8192):
        if cand <= te_cap and cand * (max(N, 128) + Cp) * 4 * 3 <= (12 << 20):
            te = cand
    Ep = _round_up(E, te)
    pad = Ep - E

    # Only tiny per-edge index/scalar vectors are padded (a few bytes per edge).
    row2 = jnp.pad(row.reshape(E, 1).astype(jnp.int32), ((0, pad), (0, 0)))
    # Padded edges point at node index N (out of iota range) -> zero one-hot
    # column -> they contribute nothing to the scatter-add.
    colT = jnp.pad(col.reshape(1, E).astype(jnp.int32), ((0, 0), (0, pad)),
                   constant_values=n_nodes)
    coef = jnp.stack([norm_e.astype(jnp.float32),
                      gate_logit_e.astype(jnp.float32)], axis=1)            # (E, 2)
    coef = jnp.pad(coef, ((0, pad), (0, 0)))

    kernel = functools.partial(_fused_edge_kernel, use_gate=use_gate,
                               n_nodes=n_nodes)
    vmem = _vmem_limit(4 * N * Cp * 4 + 3 * te * (max(N, 128) + Cp + 8) * 4)
    out = pl.pallas_call(
        kernel,
        out_shape=jax.ShapeDtypeStruct((N, Cp), jnp.float32),
        grid_spec=pltpu.PrefetchScalarGridSpec(
            num_scalar_prefetch=0,
            grid=(Ep // te,),
            in_specs=[
                pl.BlockSpec((te, 1), lambda i: (i, 0)),    # row indices
                pl.BlockSpec((1, te), lambda i: (0, i)),    # col indices (lane-major)
                pl.BlockSpec((te, 2), lambda i: (i, 0)),    # [deg-norm, gate logit]
                pl.BlockSpec((N, Cp), lambda i: (0, 0)),    # projected nodes, VMEM-resident
                pl.BlockSpec((1, Cp), lambda i: (0, 0)),    # MLP bias (lane-padded)
            ],
            out_specs=pl.BlockSpec((N, Cp), lambda i: (0, 0)),  # resident accumulator
        ),
        compiler_params=pltpu.CompilerParams(
            # shared accumulator across the edge axis -> must be sequential
            dimension_semantics=("arbitrary",),
            vmem_limit_bytes=vmem),
        cost_estimate=pl.CostEstimate(
            flops=4 * Ep * N * Cp + 4 * Ep * Cp,
            transcendentals=Ep if use_gate else 0,
            bytes_accessed=4 * (4 * Ep + N * Cp * 2 + Cp)),
    )(row2, colT, coef, y_all, bias_pad)
    return out


# ----------------------------------------------------------------------------
# NodeModelMLP.forward
# ----------------------------------------------------------------------------
def node_model_mlp_forward(x, edge_index, weight, bias, *,
                           deg_norm='sm', edge_gate='none', aggr='add',
                           gate_params=None, deg=None, edge_weight=None,
                           tile_n=1024, tile_e=2048,
                           compute_dtype=jnp.bfloat16):
    """NodeModelMLP.forward (mlp_nlay=1, edge_attr=None).

    weight: (C_out, C_in) torch nn.Linear layout; bias: (C_out,) or None.
    gate_params: (w_src (C_in,1), w_tgt (C_in,1), gate_bias (1,)) for edge_gate='proj';
                 edge_gates (E,1) free parameter for edge_gate='free'.
    compute_dtype: dtype for the node-projection MXU matmul inputs (accumulation
                 is always f32); bfloat16 halves kernel-1 HBM reads on v6e/v7x.
    """
    assert deg_norm in ('none', 'sm', 'rw')
    assert edge_gate in ('none', 'proj', 'free')
    N, C_in = x.shape
    C_out = weight.shape[0]
    row, col = edge_index[0], edge_index[1]
    E = row.shape[0]

    # Fused per-node projection [W^T | w_src | w_tgt], zero-padded to 128 lanes.
    cols = [weight.T.astype(jnp.float32)]
    if edge_gate == 'proj':
        w_src, w_tgt, gate_b = gate_params
        cols += [w_src.reshape(C_in, 1).astype(jnp.float32),
                 w_tgt.reshape(C_in, 1).astype(jnp.float32)]
    w_cat = jnp.concatenate(cols, axis=1)
    Cp = _round_up(w_cat.shape[1], 128)
    w_cat = jnp.pad(w_cat, ((0, 0), (0, Cp - w_cat.shape[1])))

    xk = x.astype(compute_dtype)
    wk = w_cat.astype(compute_dtype)

    # --- Pallas kernel 1: per-node projections (MXU, tiled over N) ----------
    y_all = _node_projection(xk, wk, tile_n)                     # (N, Cp) f32

    # --- degree-normalization constants (tiny scatter_add, plain JAX glue) --
    if deg_norm == 'none':
        norm_e = jnp.ones((E,), jnp.float32)
    else:
        ew = (jnp.ones((E,), jnp.float32) if edge_weight is None
              else edge_weight.reshape(-1).astype(jnp.float32))
        if deg is None or edge_weight is not None:
            deg = jnp.zeros((N,), jnp.float32).at[row].add(ew)
        deg = deg.astype(jnp.float32)
        if deg_norm == 'sm':
            dis = jnp.where(deg > 0, jax.lax.rsqrt(deg), 0.0)
            norm_e = dis[row] * ew * dis[col]
        else:  # 'rw'
            dinv = jnp.where(deg > 0, 1.0 / deg, 0.0)
            norm_e = dinv[row] * ew

    # --- edge-gate logits (two per-edge *scalar* gathers, plain JAX glue) ---
    use_gate = edge_gate != 'none'
    if edge_gate == 'proj':
        gate_logit_e = (y_all[:, C_out][row] + y_all[:, C_out + 1][col]
                        + gate_b.reshape(()).astype(jnp.float32))
    elif edge_gate == 'free':
        gate_logit_e = gate_params.reshape(-1).astype(jnp.float32)[:E]
    else:
        gate_logit_e = jnp.zeros((E,), jnp.float32)

    b = bias.astype(jnp.float32) if bias is not None else jnp.zeros((C_out,), jnp.float32)
    bias_pad = jnp.zeros((1, Cp), jnp.float32).at[0, :C_out].set(b)

    # --- Pallas kernel 2: fused gather + message + gate + scatter-add -------
    if 2 * N * Cp * 4 <= (20 << 20):
        out_full = _edge_aggregate(y_all, row, col, norm_e, gate_logit_e, bias_pad,
                                   use_gate=use_gate, n_nodes=N, tile_e=tile_e)
        summed = out_full[:, :C_out]
    else:
        # TODO(synk): very large graphs (projected node table exceeds VMEM budget)
        # fall back to XLA gather/scatter; a sorted-by-col segmented Pallas kernel
        # would be the next step here.
        msg = norm_e[:, None] * y_all[:, :C_out][row] + b[None, :]
        if use_gate:
            msg = jax.nn.sigmoid(gate_logit_e)[:, None] * msg
        summed = jnp.zeros((N, C_out), jnp.float32).at[col].add(msg)

    # --- aggregation flavour -------------------------------------------------
    if aggr == 'add':
        return summed
    if aggr == 'mean':
        cnt = jnp.zeros((N,), jnp.float32).at[col].add(1.0)
        return summed / jnp.maximum(cnt, 1.0)[:, None]
    # TODO(synk): aggr='max' (torch_scatter fill semantics) not implemented.
    raise NotImplementedError("aggr='max' not implemented")


# ----------------------------------------------------------------------------
# Plain-JAX transcription of the PyTorch forward, for correctness checks.
# ----------------------------------------------------------------------------
def _reference_forward(x, edge_index, weight, bias, *, deg_norm, edge_gate,
                       gate_params=None):
    N, _ = x.shape
    row, col = edge_index[0], edge_index[1]
    if deg_norm == 'none':
        x_j = x[row]
    else:
        deg = jnp.zeros((N,), jnp.float32).at[row].add(1.0)
        if deg_norm == 'sm':
            dis = jnp.where(deg > 0, deg ** -0.5, 0.0)
            x_j = x[row] * (dis[row] * dis[col])[:, None]
        else:  # 'rw'
            dinv = jnp.where(deg > 0, 1.0 / deg, 0.0)
            x_j = (x * dinv[:, None])[row]
    m = x_j @ weight.T + bias
    if edge_gate == 'proj':
        w_src, w_tgt, gb = gate_params
        eg = jax.nn.sigmoid(x[row] @ w_src + x[col] @ w_tgt + gb)
        m = eg * m
    elif edge_gate == 'free':
        m = jax.nn.sigmoid(gate_params) * m
    return jnp.zeros((N, weight.shape[0]), jnp.float32).at[col].add(m)


if __name__ == "__main__":
    N, C, E = 64, 32, 256          # nodes, channels (C_in == C_out), edges

    key = jax.random.PRNGKey(0)
    kx, ke, kw, kb, ks, kt = jax.random.split(key, 6)

    x = jax.random.normal(kx, (N, C), dtype=jnp.float32)
    edge_index = jax.random.randint(ke, (2, E), 0, N, dtype=jnp.int32)

    initrange = 0.1                 # mirrors reset_parameters uniform(-0.1, 0.1)
    weight = jax.random.uniform(kw, (C, C), jnp.float32, -initrange, initrange)
    bias = jax.random.uniform(kb, (C,), jnp.float32, -initrange, initrange)
    w_src = jax.random.uniform(ks, (C, 1), jnp.float32, -initrange, initrange)
    w_tgt = jax.random.uniform(kt, (C, 1), jnp.float32, -initrange, initrange)
    gate_b = jnp.zeros((1,), jnp.float32)
    free_gates = jnp.ones((E, 1), jnp.float32)   # EdgeGateFree init (constant 1)

    # 1) default NodeModelMLP (deg_norm='sm', edge_gate='none'), exact f32 path.
    out = jax.block_until_ready(node_model_mlp_forward(
        x, edge_index, weight, bias, deg_norm='sm', edge_gate='none',
        compute_dtype=jnp.float32))
    ref = _reference_forward(x, edge_index, weight, bias,
                             deg_norm='sm', edge_gate='none')
    assert out.shape == (N, C)
    assert bool(jnp.allclose(out, ref, rtol=1e-4, atol=1e-5)), "sm/none (f32) mismatch"

    # 2) same config with the default bf16 MXU path for kernel 1 (loose tol).
    out = jax.block_until_ready(node_model_mlp_forward(
        x, edge_index, weight, bias, deg_norm='sm', edge_gate='none'))
    assert bool(jnp.allclose(out, ref, rtol=5e-2, atol=1e-2)), "sm/none (bf16) mismatch"

    # 3) deg_norm='sm', edge_gate='proj' (bf16 kernel 1).
    out = jax.block_until_ready(node_model_mlp_forward(
        x, edge_index, weight, bias, deg_norm='sm', edge_gate='proj',
        gate_params=(w_src, w_tgt, gate_b)))
    ref = _reference_forward(x, edge_index, weight, bias, deg_norm='sm',
                             edge_gate='proj', gate_params=(w_src, w_tgt, gate_b))
    assert bool(jnp.allclose(out, ref, rtol=5e-2, atol=1e-2)), "sm/proj mismatch"

    # 4) deg_norm='rw', edge_gate='free', exact f32 path.
    out = jax.block_until_ready(node_model_mlp_forward(
        x, edge_index, weight, bias, deg_norm='rw', edge_gate='free',
        gate_params=free_gates, compute_dtype=jnp.float32))
    ref = _reference_forward(x, edge_index, weight, bias, deg_norm='rw',
                             edge_gate='free', gate_params=free_gates)
    assert bool(jnp.allclose(out, ref, rtol=1e-4, atol=1e-5)), "rw/free mismatch"

    print("KERNEL_OK")
</pallas_src>

<mosaic_0001>
module attributes {stable_mosaic.version = 11 : i64} {
  func.func @_node_proj_kernel(%arg0: i32, %arg1: memref<64x32xf32, #tpu.memory_space<vmem>>, %arg2: memref<32x128xf32, #tpu.memory_space<vmem>>, %arg3: memref<64x128xf32, #tpu.memory_space<vmem>>) attributes {dimension_semantics = [#tpu.dimension_semantics<parallel>], iteration_bounds = array<i64: 1>, scalar_prefetch = 0 : i64, scratch_operands = 0 : i64, tpu.core_type = #tpu.core_type<tc>, window_params = [{transform_indices = @transform_0, window_bounds = array<i64: 64, 32>}, {pipeline_mode = #tpu.pipeline_mode<synchronous>, transform_indices = @transform_1, window_bounds = array<i64: 32, 128>}, {transform_indices = @transform_2, window_bounds = array<i64: 64, 128>}]} {
    %c0 = arith.constant 0 : index
    %c0_0 = arith.constant 0 : index
    %0 = vector.load %arg1[%c0, %c0_0] : memref<64x32xf32, #tpu.memory_space<vmem>>, vector<64x32xf32>
    %c0_1 = arith.constant 0 : index
    %c0_2 = arith.constant 0 : index
    %1 = vector.load %arg2[%c0_1, %c0_2] : memref<32x128xf32, #tpu.memory_space<vmem>>, vector<32x128xf32>
    %cst = arith.constant dense<0.000000e+00> : vector<64x128xf32>
    %2 = tpu.matmul %0, %1, %cst {dimension_numbers = #tpu.dot_dimension_numbers<[1], [0], [0], [1], [0, 0, 1, 1], [], []>} : vector<64x32xf32>, vector<32x128xf32>, vector<64x128xf32> -> vector<64x128xf32>
    %c0_3 = arith.constant 0 : index
    %c0_4 = arith.constant 0 : index
    %3 = vector.load %arg3[%c0_3, %c0_4] : memref<64x128xf32, #tpu.memory_space<vmem>>, vector<64x128xf32>
    tpu.vector_store %arg3[%c0_3, %c0_4], %2 {strides = array<i32>} : memref<64x128xf32, #tpu.memory_space<vmem>>, vector<64x128xf32>,
    return
  }
  func.func @transform_0(%arg0: i32) -> (i32, i32) {
    %c0_i32 = arith.constant 0 : i32
    %c0_i32_0 = arith.constant 0 : i32
    return %arg0, %c0_i32 : i32, i32
  }
  func.func @transform_1(%arg0: i32) -> (i32, i32) {
    %c0_i32 = arith.constant 0 : i32
    %c0_i32_0 = arith.constant 0 : i32
    %c0_i32_1 = arith.constant 0 : i32
    return %c0_i32, %c0_i32_0 : i32, i32
  }
  func.func @transform_2(%arg0: i32) -> (i32, i32) {
    %c0_i32 = arith.constant 0 : i32
    %c0_i32_0 = arith.constant 0 : i32
    return %arg0, %c0_i32 : i32, i32
  }
}

</mosaic_0001>

<bundles_post_ra>
// kernel: tpu_custom_call.1
= control target key start
LH: loop header
LB: loop body
LE: loop exit
PB: predicated region body
PF: predicated region fallthrough
CT: control target
= control target key end

     0   :  { %s316_s0 = inlined_call_operand.vmem [shape: f32[64,32], index: 0, kind: input, shape index: {}]   ;;  %s317_s1 = inlined_call_operand.vmem [shape: f32[32,128], index: 1, kind: input, shape index: {}]   ;;  %s318_s2 = inlined_call_operand.hbm [shape: f32[64,128], index: 2, kind: output, shape index: {}]  }
   0x1   :  { %v23_v0 = vld [vmem:[%s317_s1 + $0x18] sm:$0xff]  ;;  %v22_v1 = vld [vmem:[%s317_s1 + $0x10] sm:$0xff]  ;;  %v21_v2 = vld [vmem:[%s317_s1 + $0x8] sm:$0xff] }
   0x2   :  { %198 = vmatprep.subr.mxu0 %v23_v0  ;;  %218 = vmatprep.subr.mxu1 %v23_v0  ;;  %v20_v3 = vld [vmem:[%s317_s1] sm:$0xff] }
   0x3   :  { %199 = vmatpush3.msra.mxu0 %v23_v0  ;;  %222 = vmatpush3.msra.mxu1 %v23_v0 }
   0x4   :  { %200 = vmatprep.subr.mxu0 %v22_v1  ;;  %219 = vmatprep.subr.mxu1 %v22_v1 }
   0x5   :  { %201 = vmatpush3.msra.mxu0 %v22_v1  ;;  %223 = vmatpush3.msra.mxu1 %v22_v1 }
   0x6   :  { %7 = vsyncpa [#allocation3], 0  ;;  %202 = vmatprep.subr.mxu0 %v21_v2  ;;  %220 = vmatprep.subr.mxu1 %v21_v2  ;;  %v12_v4 = vld [vmem:[%s316_s0] sm:$0xff]  ;;  %vm24_vm0 = vcmask 261120   ;;  %v13_v6 = vld [vmem:[%s316_s0 + $0x8] sm:$0xff]  ;;  %s251_s4 = smov [#allocation2]  }
   0x7   :  { %203 = vmatpush3.msra.mxu0 %v21_v2  ;;  %224 = vmatpush3.msra.mxu1 %v21_v2  ;;  %v16_v5 = vld [vmem:[%s316_s0 + $0x20] sm:$0xff]  ;;  %v17_v7 = vld [vmem:[%s316_s0 + $0x28] sm:$0xff]  ;;  %v14_v8 = vld [vmem:[%s316_s0 + $0x10] sm:$0xff]  ;;  %s167_s5 = sshll.u32 %s251_s4, 4  ;;  %s168_s5 = int_to_ptr.vmem [resolvable:$true] %s167_s5 }
   0x8   :  { %204 = vmatprep.subr.mxu0 %v20_v3  ;;  %221 = vmatprep.subr.mxu1 %v20_v3  ;;  %v18_v9 = vld [vmem:[%s316_s0 + $0x30] sm:$0xff]  ;;  %v15_v10 = vld [vmem:[%s316_s0 + $0x18] sm:$0xff]  ;;  %p234_p1 = scmp.lt.s32.totalorder %s168_s5, %s168_s5 }
   0x9   :  { %205 = vmatpush3.msra.mxu0 %v20_v3  ;;  %225 = vmatpush3.msra.mxu1 %v20_v3  ;;  %v19_v11 = vld [vmem:[%s316_s0 + $0x38] sm:$0xff]  ;;  %s229_s0 = scalar_lea.vmem %s168_s5, 1024 }
   0xa   :  { %206 = vmatprep.mubr.msk.f32.mxu0 %vm24_vm0, %v12_v4  ;;  %212 = vmatprep.mubr.msk.f32.mxu1 %vm24_vm0, %v16_v5  ;;  %p230_p0 = scmp.ne.s32.totalorder %s168_s5, %s229_s0  ;;  %p235_p2 = scmp.lt.s32.totalorder %s229_s0, %s229_s0 }
   0xb   :  { %207 = vmatmul.mubr.msk.f32.vlgmr.msra.gmra.mxu0 %vm24_vm0, %v13_v6  ;;  %213 = vmatmul.mubr.msk.f32.vlgmr.msra.gmra.mxu1 %vm24_vm0, %v17_v7 }
   0xc   :  { %209 = vmatprep.mubr.msk.f32.mxu0 %vm24_vm0, %v14_v8  ;;  %215 = vmatprep.mubr.msk.f32.mxu1 %vm24_vm0, %v18_v9  ;;  %p236_p3 = por %p235_p2, %p234_p1 }
   0xe   :  { %p237_p4 = pnand %p236_p3, %p230_p0 }
   0xf   :  { %210 = vmatmul.mubr.msk.f32.gmra.mxu0 %vm24_vm0, %v15_v10  ;;  %216 = vmatmul.mubr.msk.f32.gmra.mxu1 %vm24_vm0, %v19_v11 }
  0xcb   :  { %v208_v12 = vpop.f32.mrf.mxu0  ;;  %v214_v13 = vpop.f32.mrf.mxu1 }
  0xcc   :  { %155 = vst [vmem:[#allocation2 + $0x8] sm:$0xff] %v208_v12  ;;  %159 = vst [vmem:[#allocation2 + $0x28] sm:$0xff] %v214_v13 }
  0xcd   :  { %v115_v14 = vpop.f32.mrf.mxu0  ;;  %v135_v15 = vpop.f32.mrf.mxu1 }
  0xce   :  { %154 = vst [vmem:[#allocation2] sm:$0xff] %v115_v14  ;;  %158 = vst [vmem:[#allocation2 + $0x20] sm:$0xff] %v135_v15 }
  0xcf   :  { %v211_v16 = vpop.f32.mrf.mxu0  ;;  %v217_v17 = vpop.f32.mrf.mxu1 }
  0xd0   :  { %157 = vst [vmem:[#allocation2 + $0x18] sm:$0xff] %v211_v16  ;;  %161 = vst [vmem:[#allocation2 + $0x38] sm:$0xff] %v217_v17 }
  0xd1   :  { %v125_v18 = vpop.f32.mrf.mxu0  ;;  %v145_v19 = vpop.f32.mrf.mxu1 }
  0xd2   :  { %156 = vst [vmem:[#allocation2 + $0x10] sm:$0xff] %v125_v18  ;;  %160 = vst [vmem:[#allocation2 + $0x30] sm:$0xff] %v145_v19 }
  0xd3   :  { %240 = shalt.err (!%p237_p4)
}
  0xd4   :  { %s252_s6 = smov 128   ;;  %s253_s7 = smov 8  }
  0xd5   :  { %173 = dma.vmem_to_hbm [thread:$0]  %s168_s5, 1024, %s318_s2, [#allocation3], %s252_s6, %s252_s6, %s253_s7  }
  0xd6   :  { %249 = dma.done.wait [#allocation3], 1024  }
  0xd7   :  { %250 = vsyncadd [#allocation3], 4294966272 }
  0xd8   :  { %177 = vsyncpa [#allocation3], 1 }

</bundles_post_ra>
